<compile_context>
chip_gen: v7x
topology: tpu7x:2x2x1
jax: 0.10.0
libtpu: 0.0.40
codegen_flags: <defaults>
</compile_context>

<pallas_src>
import functools

import jax
import jax.numpy as jnp
from jax.experimental import pallas as pl
from jax.experimental.pallas import tpu as pltpu


# --------------------------------------------------------------------------
# Pallas kernels
# --------------------------------------------------------------------------

def _se_fused_kernel(x_ref, w1_ref, w2_ref, o_ref):
    """Fully fused SE for one batch element.

    x_ref: (1, C, HW)   w1_ref: (Cr, C)   w2_ref: (C, Cr)   o_ref: (1, C, HW)
    """
    xb = x_ref[0]                                            # (C, HW)
    pooled = jnp.mean(xb, axis=1, keepdims=True)             # (C, 1)  XLU reduce
    h = jnp.dot(w1_ref[...], pooled,
                preferred_element_type=jnp.float32)          # (Cr, 1)
    h = jnp.maximum(h, 0.0)
    y = jnp.dot(w2_ref[...], h,
                preferred_element_type=jnp.float32)          # (C, 1)
    scale = jax.nn.sigmoid(y)
    o_ref[0] = xb * scale                                    # broadcast over lanes


def _se_pool_mlp_kernel(x_ref, w1_ref, w2_ref, y_ref, acc_ref, *, inv_hw):
    """Pass 1 (large path): accumulate spatial sum over lane tiles, then run
    the MLP + sigmoid on the last tile.  Reduction axis is the last grid axis.
    """
    t = pl.program_id(1)

    @pl.when(t == 0)
    def _init():
        acc_ref[...] = jnp.zeros_like(acc_ref)

    acc_ref[...] += jnp.sum(x_ref[0], axis=1, keepdims=True)  # (C, 1)

    @pl.when(t == pl.num_programs(1) - 1)
    def _finalize():
        pooled = acc_ref[...] * inv_hw                        # mean
        h = jnp.dot(w1_ref[...], pooled,
                    preferred_element_type=jnp.float32)       # (Cr, 1)
        h = jnp.maximum(h, 0.0)
        y = jnp.dot(w2_ref[...], h,
                    preferred_element_type=jnp.float32)       # (C, 1)
        y_ref[0] = jax.nn.sigmoid(y)


def _se_scale_kernel(x_ref, y_ref, o_ref):
    """Pass 2 (large path): x * scale, tiled along the lane (HW) axis."""
    o_ref[0] = x_ref[0] * y_ref[0]                            # (C, thw) * (C, 1)


# --------------------------------------------------------------------------
# pallas_call wrappers
# --------------------------------------------------------------------------

def _se_fused(x3, w1, w2):
    n, c, hw = x3.shape
    cr = w1.shape[0]
    return pl.pallas_call(
        _se_fused_kernel,
        out_shape=jax.ShapeDtypeStruct((n, c, hw), jnp.float32),
        grid=(n,),
        in_specs=[
            pl.BlockSpec((1, c, hw), lambda i: (i, 0, 0)),
            pl.BlockSpec((cr, c), lambda i: (0, 0)),
            pl.BlockSpec((c, cr), lambda i: (0, 0)),
        ],
        out_specs=pl.BlockSpec((1, c, hw), lambda i: (i, 0, 0)),
        compiler_params=pltpu.CompilerParams(
            dimension_semantics=("parallel",)),
    )(x3, w1, w2)


def _se_tiled(x3, w1, w2, tile):
    n, c, hw = x3.shape
    cr = w1.shape[0]
    nt = hw // tile

    pool_kernel = functools.partial(_se_pool_mlp_kernel, inv_hw=1.0 / float(hw))
    scales = pl.pallas_call(
        pool_kernel,
        out_shape=jax.ShapeDtypeStruct((n, c, 1), jnp.float32),
        grid=(n, nt),
        in_specs=[
            pl.BlockSpec((1, c, tile), lambda i, t: (i, 0, t)),
            pl.BlockSpec((cr, c), lambda i, t: (0, 0)),
            pl.BlockSpec((c, cr), lambda i, t: (0, 0)),
        ],
        out_specs=pl.BlockSpec((1, c, 1), lambda i, t: (i, 0, 0)),
        scratch_shapes=[pltpu.VMEM((c, 1), jnp.float32)],
        compiler_params=pltpu.CompilerParams(
            dimension_semantics=("parallel", "arbitrary")),
    )(x3, w1, w2)

    return pl.pallas_call(
        _se_scale_kernel,
        out_shape=jax.ShapeDtypeStruct((n, c, hw), jnp.float32),
        grid=(n, nt),
        in_specs=[
            pl.BlockSpec((1, c, tile), lambda i, t: (i, 0, t)),
            pl.BlockSpec((1, c, 1), lambda i, t: (i, 0, 0)),
        ],
        out_specs=pl.BlockSpec((1, c, tile), lambda i, t: (i, 0, t)),
        compiler_params=pltpu.CompilerParams(
            dimension_semantics=("parallel", "parallel")),
    )(x3, scales)


def _pick_lane_tile(hw, c, max_block_bytes=1 << 20):
    """Largest multiple-of-128 divisor of hw whose (c, tile) f32 block fits."""
    best = None
    t = 128
    while t <= hw:
        if hw % t == 0 and c * t * 4 <= max_block_bytes:
            best = t
        t += 128
    return best


def se_layer(x, w1, w2, *, fused_slab_limit=2 * 1024 * 1024,
             force_tiled=False, lane_tile=None):
    """SELayer forward.  x: (B, C, H, W) f32.  w1: (C//r, C), w2: (C, C//r)
    in PyTorch nn.Linear (out_features, in_features) layout, bias-free."""
    b, c, h, w = x.shape
    hw = h * w
    x3 = x.reshape(b, c, hw).astype(jnp.float32)

    tile = lane_tile if lane_tile is not None else _pick_lane_tile(hw, c)
    slab_bytes = c * hw * 4
    use_tiled = (force_tiled or slab_bytes > fused_slab_limit) and tile is not None

    if use_tiled:
        out = _se_tiled(x3, w1, w2, tile)
    else:
        # Per-batch slab fits comfortably in VMEM (even double-buffered on
        # v7x's 64 MiB) -> fully fused: one HBM read + one HBM write of x.
        out = _se_fused(x3, w1, w2)
    return out.reshape(b, c, h, w)


# --------------------------------------------------------------------------
# Pure-JAX reference (for correctness self-check)
# --------------------------------------------------------------------------

def _se_ref(x, w1, w2):
    y = jnp.mean(x, axis=(2, 3))                 # (B, C)
    y = jnp.maximum(y @ w1.T, 0.0)               # (B, Cr)
    y = jax.nn.sigmoid(y @ w2.T)                 # (B, C)
    return x * y[:, :, None, None]


# --------------------------------------------------------------------------

if __name__ == "__main__":
    key = jax.random.PRNGKey(0)
    kx, k1, k2 = jax.random.split(key, 3)

    # Small shapes consistent with the module: batch=2, channels=64,
    # spatial=16x16, reduction=16 -> hidden=4.
    b, c, h, w = 2, 64, 16, 16
    reduction = 16
    cr = c // reduction

    x = jax.random.normal(kx, (b, c, h, w), jnp.float32)
    bound1 = 1.0 / (c ** 0.5)
    w1 = jax.random.uniform(k1, (cr, c), jnp.float32, minval=-bound1, maxval=bound1)
    bound2 = 1.0 / (cr ** 0.5)
    w2 = jax.random.uniform(k2, (c, cr), jnp.float32, minval=-bound2, maxval=bound2)

    ref = _se_ref(x, w1, w2)

    # Fused single-pass path (default for small feature maps).
    out = jax.jit(se_layer)(x, w1, w2)
    jax.block_until_ready(out)
    assert out.shape == x.shape and out.dtype == jnp.float32
    assert bool(jnp.all(jnp.isfinite(out)))
    assert bool(jnp.allclose(out, ref, atol=1e-3, rtol=1e-3)), \
        float(jnp.max(jnp.abs(out - ref)))

    # Tiled reduce-pass + rescale-pass path (used when the per-batch slab
    # would blow the VMEM budget); forced here with 128-lane tiles to
    # exercise the accumulator init/finalize logic.
    out_t = jax.jit(functools.partial(se_layer, force_tiled=True, lane_tile=128))(
        x, w1, w2)
    jax.block_until_ready(out_t)
    assert bool(jnp.allclose(out_t, ref, atol=1e-3, rtol=1e-3)), \
        float(jnp.max(jnp.abs(out_t - ref)))

    print("KERNEL_OK")
</pallas_src>

<mosaic_0001>
module attributes {stable_mosaic.version = 11 : i64} {
  func.func @_se_fused_kernel(%arg0: i32, %arg1: memref<1x64x256xf32, #tpu.memory_space<vmem>>, %arg2: memref<4x64xf32, #tpu.memory_space<vmem>>, %arg3: memref<64x4xf32, #tpu.memory_space<vmem>>, %arg4: memref<1x64x256xf32, #tpu.memory_space<vmem>>) attributes {dimension_semantics = [#tpu.dimension_semantics<parallel>], iteration_bounds = array<i64: 2>, scalar_prefetch = 0 : i64, scratch_operands = 0 : i64, tpu.core_type = #tpu.core_type<tc>, window_params = [{transform_indices = @transform_0, window_bounds = array<i64: 1, 64, 256>}, {pipeline_mode = #tpu.pipeline_mode<synchronous>, transform_indices = @transform_1, window_bounds = array<i64: 4, 64>}, {pipeline_mode = #tpu.pipeline_mode<synchronous>, transform_indices = @transform_2, window_bounds = array<i64: 64, 4>}, {transform_indices = @transform_3, window_bounds = array<i64: 1, 64, 256>}]} {
    %c0 = arith.constant 0 : index
    %c0_0 = arith.constant 0 : index
    %c0_1 = arith.constant 0 : index
    %0 = vector.load %arg1[%c0, %c0_0, %c0_1] : memref<1x64x256xf32, #tpu.memory_space<vmem>>, vector<1x64x256xf32>
    %1 = vector.shape_cast %0 : vector<1x64x256xf32> to vector<64x256xf32>
    %cst = arith.constant dense<0.000000e+00> : vector<64xf32>
    %2 = vector.multi_reduction <add>, %1, %cst [1] : vector<64x256xf32> to vector<64xf32>
    %3 = vector.shape_cast %2 : vector<64xf32> to vector<64x1xf32>
    %cst_2 = arith.constant 2.560000e+02 : f32
    %4 = vector.broadcast %cst_2 : f32 to vector<64x1xf32>
    %5 = arith.divf %3, %4 : vector<64x1xf32>
    %c0_3 = arith.constant 0 : index
    %c0_4 = arith.constant 0 : index
    %6 = vector.load %arg2[%c0_3, %c0_4] : memref<4x64xf32, #tpu.memory_space<vmem>>, vector<4x64xf32>
    %cst_5 = arith.constant dense<0.000000e+00> : vector<4x1xf32>
    %7 = tpu.matmul %6, %5, %cst_5 {dimension_numbers = #tpu.dot_dimension_numbers<[1], [0], [0], [1], [0, 0, 1, 1], [], []>} : vector<4x64xf32>, vector<64x1xf32>, vector<4x1xf32> -> vector<4x1xf32>
    %cst_6 = arith.constant 0.000000e+00 : f32
    %8 = vector.broadcast %cst_6 : f32 to vector<4x1xf32>
    %9 = arith.maximumf %7, %8 : vector<4x1xf32>
    %c0_7 = arith.constant 0 : index
    %c0_8 = arith.constant 0 : index
    %10 = vector.load %arg3[%c0_7, %c0_8] : memref<64x4xf32, #tpu.memory_space<vmem>>, vector<64x4xf32>
    %cst_9 = arith.constant dense<0.000000e+00> : vector<64x1xf32>
    %11 = tpu.matmul %10, %9, %cst_9 {dimension_numbers = #tpu.dot_dimension_numbers<[1], [0], [0], [1], [0, 0, 1, 1], [], []>} : vector<64x4xf32>, vector<4x1xf32>, vector<64x1xf32> -> vector<64x1xf32>
    %12 = arith.negf %11 : vector<64x1xf32>
    %13 = math.exp %12 : vector<64x1xf32>
    %cst_10 = arith.constant 1.000000e+00 : f32
    %14 = vector.broadcast %cst_10 : f32 to vector<64x1xf32>
    %15 = arith.addf %14, %13 : vector<64x1xf32>
    %16 = arith.divf %14, %15 : vector<64x1xf32>
    %17 = vector.broadcast %16 : vector<64x1xf32> to vector<64x256xf32>
    %18 = arith.mulf %1, %17 : vector<64x256xf32>
    %c0_11 = arith.constant 0 : index
    %c0_12 = arith.constant 0 : index
    %c0_13 = arith.constant 0 : index
    %19 = vector.load %arg4[%c0_11, %c0_12, %c0_13] : memref<1x64x256xf32, #tpu.memory_space<vmem>>, vector<1x64x256xf32>
    %20 = vector.shape_cast %19 : vector<1x64x256xf32> to vector<64x256xf32>
    %21 = vector.shape_cast %18 : vector<64x256xf32> to vector<1x64x256xf32>
    tpu.vector_store %arg4[%c0_11, %c0_12, %c0_13], %21 {strides = array<i32>} : memref<1x64x256xf32, #tpu.memory_space<vmem>>, vector<1x64x256xf32>,
    return
  }
  func.func @transform_0(%arg0: i32) -> (i32, i32, i32) {
    %c0_i32 = arith.constant 0 : i32
    %c0_i32_0 = arith.constant 0 : i32
    %c0_i32_1 = arith.constant 0 : i32
    return %arg0, %c0_i32, %c0_i32_0 : i32, i32, i32
  }
  func.func @transform_1(%arg0: i32) -> (i32, i32) {
    %c0_i32 = arith.constant 0 : i32
    %c0_i32_0 = arith.constant 0 : i32
    %c0_i32_1 = arith.constant 0 : i32
    return %c0_i32, %c0_i32_0 : i32, i32
  }
  func.func @transform_2(%arg0: i32) -> (i32, i32) {
    %c0_i32 = arith.constant 0 : i32
    %c0_i32_0 = arith.constant 0 : i32
    %c0_i32_1 = arith.constant 0 : i32
    return %c0_i32, %c0_i32_0 : i32, i32
  }
  func.func @transform_3(%arg0: i32) -> (i32, i32, i32) {
    %c0_i32 = arith.constant 0 : i32
    %c0_i32_0 = arith.constant 0 : i32
    %c0_i32_1 = arith.constant 0 : i32
    return %arg0, %c0_i32, %c0_i32_0 : i32, i32, i32
  }
}

</mosaic_0001>

<bundles_post_ra>
// kernel: se_layer.1
= control target key start
LH: loop header
LB: loop body
LE: loop exit
PB: predicated region body
PF: predicated region fallthrough
CT: control target
= control target key end

     0   :  { %s785_s12 = smov 0   ;;  %s926_s0 = inlined_call_operand.vmem [shape: f32[2,64,256], index: 0, kind: input, shape index: {}]   ;;  %s927_s1 = inlined_call_operand.vmem [shape: f32[4,64], index: 1, kind: input, shape index: {}]   ;;  %s928_s2 = inlined_call_operand.vmem [shape: f32[64,4], index: 2, kind: input, shape index: {}]   ;;  %s929_s3 = inlined_call_operand.vmem [shape: f32[2,64,256], index: 3, kind: output, shape index: {}]  }
   0x1 LB: > { %s613_s13 = sadd.s32 4294967295, %s759_s12   ;;  %p617_p0 = scmp.ge.s32.totalorder %s759_s12, 1  ;;  %s759_s12 = sphi %s785_s12, %s13_s12  }
   0x2   : > { %p137_p1 = scmp.lt.s32.totalorder %s759_s12, 3 }
   0x4   : > { %p138_p2 = pnand %p617_p0, %p137_p1 }
   0x5   : > { %p161_p3 = scmp.lt.s32.totalorder (!%p138_p2), %s613_s13, 1  ;;  %v761_v24 = vmov (!%p138_p2), 0.0|0.0   ;;  %vm762_vm0 = vmmov (!%p138_p2), 0   ;;  %v763_v25 = vmov (!%p138_p2), 0.0   ;;  %v220_v46 = vld [vmem:[%s927_s1] sm:$0xf] (!%p138_p2) }
   0x6   : > { %141 = sbr.rel (%p138_p2) target bundleno = 794 (0x31a), region = 32  ;;  %695 = vmatprep.subr.bf16.mxu0 (!%p138_p2), %v761_v24  ;;  %678 = vmatprep.mubr.msk.f32.mxu0 (!%p138_p2), %vm762_vm0, %v763_v25  ;;  %vm221_vm1 = vcmask (!%p138_p2), 523264   ;;  %v296_v47 = vld [vmem:[%s928_s2] sm:$0xff] (!%p138_p2)  ;;  %vm304_vm2 = vcmask (!%p138_p2), 31744   ;;  %vm329_vm3 = vcmask (!%p138_p2), 1043456   ;;  %v297_v51 = vld [vmem:[%s928_s2 + $0x8] sm:$0xff] (!%p138_p2) }
   0x7   : > { %683 = vmatprep.mubr.msk.f32.mxu1 (!%p138_p2), %vm304_vm2, %v296_v47  ;;  %v298_v52 = vld [vmem:[%s928_s2 + $0x10] sm:$0xff] (!%p138_p2)  ;;  %v299_v53 = vld [vmem:[%s928_s2 + $0x18] sm:$0xff] (!%p138_p2)  ;;  %v300_v54 = vld [vmem:[%s928_s2 + $0x20] sm:$0xff] (!%p138_p2)  ;;  %v764_v58 = vmov (!%p138_p2), 0  }
   0x8   : > { %v301_v55 = vld [vmem:[%s928_s2 + $0x28] sm:$0xff] (!%p138_p2)  ;;  %v302_v56 = vld [vmem:[%s928_s2 + $0x30] sm:$0xff] (!%p138_p2)  ;;  %v303_v57 = vld [vmem:[%s928_s2 + $0x38] sm:$0xff] (!%p138_p2)  ;;  %720 = vset.pattern.permute.xlu1 (!%p138_p2), %v764_v58  ;;  %719 = vset.pattern.permute.xlu0 (!%p138_p2), %v764_v58 }
   0xd   : > { %s931_s13 = smov (!%p161_p3, %s613_s13), 1 }
   0xe   : > { %s642_s14 = sshll.u32 %s931_s13, 7 }
   0xf   : > { %s165_s17 = scalar_lea.vmem %s926_s0, %s642_s14  ;;  %s889_s11 = scalar_lea.vmem %s929_s3, %s642_s14 }
  0x10   : > { %v801_v0 = vld [vmem:[%s165_s17 + $0x20] sm:$0xff]  ;;  %v803_v1 = vld [vmem:[%s165_s17 + $0x28] sm:$0xff]  ;;  %v811_v5 = vld [vmem:[%s165_s17 + $0x30] sm:$0xff] }
  0x11   : > { %v805_v2 = vld [vmem:[%s165_s17] sm:$0xff]  ;;  %v193_v3 = vadd.f32 %v803_v1, %v801_v0  ;;  %v809_v4 = vld [vmem:[%s165_s17 + $0x8] sm:$0xff]  ;;  %v813_v6 = vld [vmem:[%s165_s17 + $0x38] sm:$0xff] }
  0x12   : > { %v187_v7 = vadd.f32 %v809_v4, %v805_v2  ;;  %v817_v8 = vld [vmem:[%s165_s17 + $0x10] sm:$0xff]  ;;  %v819_v9 = vld [vmem:[%s165_s17 + $0x18] sm:$0xff]  ;;  %v196_v10 = vadd.f32 %v813_v6, %v811_v5  ;;  %v829_v14 = vld [vmem:[%s165_s17 + $0x40] sm:$0xff] }
  0x13   : > { %194 = vadd.xlane.f32.xlu1 %v193_v3  ;;  %v190_v11 = vadd.f32 %v819_v9, %v817_v8  ;;  %v825_v12 = vld [vmem:[%s165_s17 + $0x50] sm:$0xff]  ;;  %v827_v13 = vld [vmem:[%s165_s17 + $0x58] sm:$0xff]  ;;  %v831_v15 = vld [vmem:[%s165_s17 + $0x48] sm:$0xff] }
  0x14   : > { %188 = vadd.xlane.f32.xlu0 %v187_v7  ;;  %v202_v16 = vadd.f32 %v827_v13, %v825_v12  ;;  %v199_v17 = vadd.f32 %v831_v15, %v829_v14  ;;  %v837_v18 = vld [vmem:[%s165_s17 + $0x70] sm:$0xff]  ;;  %v839_v19 = vld [vmem:[%s165_s17 + $0x78] sm:$0xff]  ;;  %v841_v20 = vld [vmem:[%s165_s17 + $0x60] sm:$0xff] }
  0x15   : > { %v843_v21 = vld [vmem:[%s165_s17 + $0x68] sm:$0xff]  ;;  %v208_v22 = vadd.f32 %v839_v19, %v837_v18 }
  0x16   : > { %v205_v23 = vadd.f32 %v843_v21, %v841_v20 }
  0x17   : > { %197 = vadd.xlane.f32.xlu1 %v196_v10 }
  0x18   : > { %191 = vadd.xlane.f32.xlu0 %v190_v11 }
  0x1b   : > { %203 = vadd.xlane.f32.xlu1 %v202_v16 }
  0x1c   : > { %200 = vadd.xlane.f32.xlu0 %v199_v17 }
  0x1f   : > { %209 = vadd.xlane.f32.xlu1 %v208_v22 }
  0x20   : > { %206 = vadd.xlane.f32.xlu0 %v205_v23 }
  0xa0   : > { %v195_v26 = vpop.xlane.xlu1 %194 }
  0xa1   : > { %v189_v27 = vpop.xlane.xlu0 %188  ;;  %v214_v32 = vmul.f32 0.00390625, %v195_v26 }
  0xa2   : > { %v212_v30 = vmul.f32 0.00390625, %v189_v27 }
  0xa4   : > { %v198_v28 = vpop.xlane.xlu1 %197 }
  0xa5   : > { %v192_v29 = vpop.xlane.xlu0 %191  ;;  %v215_v33 = vmul.f32 0.00390625, %v198_v28 }
  0xa6   : > { %v213_v31 = vmul.f32 0.00390625, %v192_v29 }
  0xa7   : > { %v699_v39 = vpack.c.bf16 %v215_v33, %v214_v32 }
  0xa8   : > { %v696_v34 = vpack.c.bf16 %v213_v31, %v212_v30  ;;  %v204_v35 = vpop.xlane.xlu1 %203 }
  0xa9   : > { %v201_v36 = vpop.xlane.xlu0 %200  ;;  %v217_v37 = vmul.f32 0.00390625, %v204_v35 }
  0xaa   : > { %697 = vmatpush3.bf16.msra.mxu0 %v696_v34  ;;  %v216_v38 = vmul.f32 0.00390625, %v201_v36 }
  0xab   : > { %698 = vmatprep.subr.bf16.mxu0 %v761_v24 }
  0xac   : > { %v210_v40 = vpop.xlane.xlu1 %209  ;;  %v702_v42 = vpack.c.bf16 %v217_v37, %v216_v38 }
  0xad   : > { %v207_v41 = vpop.xlane.xlu0 %206  ;;  %v219_v43 = vmul.f32 0.00390625, %v210_v40 }
  0xae   : > { %700 = vmatpush3.bf16.msra.mxu0 %v699_v39  ;;  %v218_v44 = vmul.f32 0.00390625, %v207_v41 }
  0xaf   : > { %701 = vmatprep.subr.bf16.mxu0 %v761_v24 }
  0xb0   : > { %v705_v45 = vpack.c.bf16 %v219_v43, %v218_v44 }
  0xb2   : > { %703 = vmatpush3.bf16.msra.mxu0 %v702_v42 }
  0xb3   : > { %704 = vmatprep.subr.bf16.mxu0 %v761_v24 }
  0xb6   : > { %706 = vmatpush3.bf16.msra.mxu0 %v705_v45 }
  0xb9   : > { %679 = vmatmul.mubr.msk.f32.vlgmr.msra.gmra.mrb[0].mxu0 %vm221_vm1, %v220_v46 }
 0x18c   : > { %v291_v48 = vpop.f32.mrb[0].mxu0 }
 0x18d   : > { %v295_v49 = vmax.f32 %v291_v48, 0.0  ;;  %v680_v50 = vpop.f32.mrb[1].mxu0 }
 0x18f   : > { %681 = vmatprep.subr.msk.mxu1 %vm329_vm3, %v295_v49 }
 0x190   : > { %682 = vmatpush3.msk.msra.mxu1 %vm329_vm3, %v295_v49 }
 0x191   : > { %684 = vmatmul.mubr.msk.f32.vlgmr.msra.gmra.mrb[0].mxu1 %vm304_vm2, %v297_v51 }
 0x192   : > { %686 = vmatprep.mubr.msk.f32.mxu1 %vm304_vm2, %v298_v52 }
 0x195   : > { %687 = vmatmul.mubr.msk.f32.gmra.mrb[2].mxu1 %vm304_vm2, %v299_v53 }
 0x196   : > { %689 = vmatprep.mubr.msk.f32.mxu1 %vm304_vm2, %v300_v54 }
 0x199   : > { %690 = vmatmul.mubr.msk.f32.gmra.mrb[4].mxu1 %vm304_vm2, %v301_v55 }
 0x19a   : > { %692 = vmatprep.mubr.msk.f32.mxu1 %vm304_vm2, %v302_v56 }
 0x19d   : > { %693 = vmatmul.mubr.msk.f32.gmra.mrb[6].mxu1 %vm304_vm2, %v303_v57 }
 0x264   : > { %v685_v59 = vpop.f32.mrb[0].mxu1 }
 0x265   : > { %v633_v60 = vmul.f32 -1.442695, %v685_v59  ;;  %v399_v61 = vpop.f32.mrb[1].mxu1 }
 0x266   : > { %v632_v62 = vmul.f32 -1.442695, %v399_v61 }
 0x267   : > { %721 = vpow2.f32 %v633_v60 }
 0x268   : > { %723 = vpow2.f32 %v632_v62  ;;  %v688_v63 = vpop.f32.mrb[2].mxu1 }
 0x269   : > { %v635_v3 = vmul.f32 -1.442695, %v688_v63  ;;  %v409_v7 = vpop.f32.mrb[3].mxu1 }
 0x26a   : > { %v634_v10 = vmul.f32 -1.442695, %v409_v7 }
 0x26b   : > { %725 = vpow2.f32 %v635_v3 }
 0x26c   : > { %727 = vpow2.f32 %v634_v10  ;;  %v691_v11 = vpop.f32.mrb[4].mxu1 }
 0x26d   : > { %v637_v16 = vmul.f32 -1.442695, %v691_v11  ;;  %v419_v17 = vpop.f32.mrb[5].mxu1 }
 0x26e   : > { %v636_v22 = vmul.f32 -1.442695, %v419_v17 }
 0x26f   : > { %729 = vpow2.f32 %v637_v16 }
 0x270   : > { %v694_v23 = vpop.f32.mrb[6].mxu1  ;;  %731 = vpow2.f32 %v636_v22 }
 0x271   : > { %v722_v24 = vpop.eup %721  ;;  %v429_v25 = vpop.f32.mrb[7].mxu1  ;;  %v639_v33 = vmul.f32 -1.442695, %v694_v23 }
 0x272   : > { %v724_v26 = vpop.eup %723  ;;  %v463_v27 = vadd.f32 1.0, %v722_v24  ;;  %v638_v28 = vmul.f32 -1.442695, %v429_v25 }
 0x273   : > { %v462_v29 = vadd.f32 1.0, %v724_v26 }
 0x274   : > { %733 = vrcp.f32 %v463_v27 }
 0x275   : > { %v726_v30 = vpop.eup %725  ;;  %735 = vrcp.f32 %v462_v29 }
 0x276   : > { %v728_v31 = vpop.eup %727  ;;  %v465_v32 = vadd.f32 1.0, %v726_v30  ;;  %737 = vpow2.f32 %v638_v28 }
 0x277   : > { %v464_v34 = vadd.f32 1.0, %v728_v31 }
 0x278   : > { %739 = vrcp.f32 %v465_v32 }
 0x279   : > { %v730_v35 = vpop.eup %729  ;;  %741 = vpow2.f32 %v639_v33 }
 0x27a   : > { %v467_v36 = vadd.f32 1.0, %v730_v35  ;;  %743 = vrcp.f32 %v464_v34  ;;  %v732_v37 = vpop.eup %731 }
 0x27b   : > { %v466_v41 = vadd.f32 1.0, %v732_v37 }
 0x27c   : > { %745 = vrcp.f32 %v467_v36 }
 0x27d   : > { %747 = vrcp.f32 %v466_v41 }
 0x27e   : > { %v734_v38 = vpop.eup %733 }
 0x27f   : > { %v736_v39 = vpop.eup %735  ;;  %493 = vperm.xlu1 %720, %v734_v38  }
 0x280   : > { %v738_v40 = vpop.eup %737  ;;  %488 = vperm.xlu0 %719, %v736_v39  }
 0x281   : > { %v468_v43 = vadd.f32 1.0, %v738_v40 }
 0x282   : > { %v740_v42 = vpop.eup %739 }
 0x283   : > { %503 = vperm.xlu1 %720, %v740_v42   ;;  %v742_v44 = vpop.eup %741  ;;  %749 = vrcp.f32 %v468_v43 }
 0x284   : > { %v744_v45 = vpop.eup %743  ;;  %v469_v47 = vadd.f32 1.0, %v742_v44 }
 0x286   : > { %v746_v46 = vpop.eup %745  ;;  %751 = vrcp.f32 %v469_v47 }
 0x287   : > { %498 = vperm.xlu1 %720, %v744_v45   ;;  %v748_v48 = vpop.eup %747 }
 0x28b   : > { %513 = vperm.xlu1 %720, %v746_v46  }
 0x28d   : > { %v750_v49 = vpop.eup %749 }
 0x28f   : > { %508 = vperm.xlu1 %720, %v748_v48  }
 0x290   : > { %v752_v50 = vpop.eup %751 }
 0x293   : > { %518 = vperm.xlu1 %720, %v750_v49  }
 0x297   : > { %523 = vperm.xlu1 %720, %v752_v50  }
 0x2fe   : > { %v494_v51 = vpop.permute.xlu1 %493 }
 0x2ff   : > { %v528_v52 = vmul.f32 %v494_v51, %v817_v8  ;;  %v529_v53 = vmul.f32 %v494_v51, %v819_v9  ;;  %v489_v54 = vpop.permute.xlu0 %488 }
 0x300   : > { %v526_v55 = vmul.f32 %v489_v54, %v805_v2  ;;  %v527_v56 = vmul.f32 %v489_v54, %v809_v4 }
 0x301   : > { %544 = vst [vmem:[%s889_s11 + $0x10] sm:$0xff] %v528_v52  ;;  %545 = vst [vmem:[%s889_s11 + $0x18] sm:$0xff] %v529_v53 }
 0x302   : > { %542 = vst [vmem:[%s889_s11] sm:$0xff] %v526_v55  ;;  %543 = vst [vmem:[%s889_s11 + $0x8] sm:$0xff] %v527_v56  ;;  %v504_v57 = vpop.permute.xlu1 %503 }
 0x303   : > { %v532_v58 = vmul.f32 %v504_v57, %v811_v5  ;;  %v533_v8 = vmul.f32 %v504_v57, %v813_v6 }
 0x305   : > { %548 = vst [vmem:[%s889_s11 + $0x30] sm:$0xff] %v532_v58  ;;  %549 = vst [vmem:[%s889_s11 + $0x38] sm:$0xff] %v533_v8 }
 0x306   : > { %v499_v9 = vpop.permute.xlu1 %498 }
 0x307   : > { %v530_v2 = vmul.f32 %v499_v9, %v801_v0  ;;  %v531_v4 = vmul.f32 %v499_v9, %v803_v1 }
 0x309   : > { %546 = vst [vmem:[%s889_s11 + $0x20] sm:$0xff] %v530_v2  ;;  %547 = vst [vmem:[%s889_s11 + $0x28] sm:$0xff] %v531_v4 }
 0x30a   : > { %v514_v59 = vpop.permute.xlu1 %513 }
 0x30b   : > { %v536_v60 = vmul.f32 %v514_v59, %v825_v12  ;;  %v537_v5 = vmul.f32 %v514_v59, %v827_v13 }
 0x30d   : > { %552 = vst [vmem:[%s889_s11 + $0x50] sm:$0xff] %v536_v60  ;;  %553 = vst [vmem:[%s889_s11 + $0x58] sm:$0xff] %v537_v5 }
 0x30e   : > { %v509_v6 = vpop.permute.xlu1 %508 }
 0x30f   : > { %v534_v61 = vmul.f32 %v509_v6, %v829_v14  ;;  %v535_v0 = vmul.f32 %v509_v6, %v831_v15 }
 0x311   : > { %550 = vst [vmem:[%s889_s11 + $0x40] sm:$0xff] %v534_v61  ;;  %551 = vst [vmem:[%s889_s11 + $0x48] sm:$0xff] %v535_v0 }
 0x312   : > { %v519_v1 = vpop.permute.xlu1 %518 }
 0x313   : > { %v538_v62 = vmul.f32 %v519_v1, %v841_v20  ;;  %v539_v63 = vmul.f32 %v519_v1, %v843_v21 }
 0x315   : > { %554 = vst [vmem:[%s889_s11 + $0x60] sm:$0xff] %v538_v62  ;;  %555 = vst [vmem:[%s889_s11 + $0x68] sm:$0xff] %v539_v63 }
 0x316   : > { %v524_v12 = vpop.permute.xlu1 %523 }
 0x317   : > { %v540_v13 = vmul.f32 %v524_v12, %v837_v18  ;;  %v541_v3 = vmul.f32 %v524_v12, %v839_v19 }
 0x319   : > { %556 = vst [vmem:[%s889_s11 + $0x70] sm:$0xff] %v540_v13  ;;  %557 = vst [vmem:[%s889_s11 + $0x78] sm:$0xff] %v541_v3 }
 0x31a PF: > { %s13_s12 = sadd.s32 1, %s759_s12  }
 0x31b   : > { %p10_p4 = scmp.ge.s32.totalorder %s13_s12, 4  }
 0x31d   :  { %12 = sbr.rel (!%p10_p4) target bundleno = 1 (0x1), region = 62 }

</bundles_post_ra>
